<compile_context>
chip_gen: v7x
topology: tpu7x:2x2x1
jax: 0.10.0
libtpu: 0.0.40
codegen_flags: <defaults>
</compile_context>

<pallas_src>
import functools

import jax
import jax.numpy as jnp
from jax import lax
from jax.experimental import pallas as pl
from jax.experimental.pallas import tpu as pltpu


# --------------------------------------------------------------------------- #
# Kernel
# --------------------------------------------------------------------------- #
def _merge_ln_reduce_kernel(x_ref, w0_ref, w1_ref, b_ref, o_ref, *, eps, inv_4c):
    # x_ref : (tg, 2, W2, 2C)  hp=0 rows hold [x0|x2] chans, hp=1 hold [x1|x3]
    # w0_ref: (2C, Coutp)      rows of gamma*W for the [x0|x2] channels
    # w1_ref: (2C, Coutp)      rows of gamma*W for the [x1|x3] channels
    # b_ref : (1, Coutp)       beta @ W
    # o_ref : (tg, W2, Coutp)
    tg, _, w2, two_c = x_ref.shape
    n = tg * w2

    x = x_ref[...]
    h0 = x[:, 0].reshape(n, two_c).astype(jnp.float32)
    h1 = x[:, 1].reshape(n, two_c).astype(jnp.float32)

    # LayerNorm statistics over all 4C channels (split across the two halves).
    mu = (jnp.sum(h0, -1, keepdims=True) + jnp.sum(h1, -1, keepdims=True)) * inv_4c
    c0 = h0 - mu
    c1 = h1 - mu
    var = (jnp.sum(c0 * c0, -1, keepdims=True)
           + jnp.sum(c1 * c1, -1, keepdims=True)) * inv_4c
    inv = lax.rsqrt(var + eps)

    # Affine is folded into w0/w1/bias; feed the MXU in the weight dtype,
    # accumulate in f32.
    n0 = (c0 * inv).astype(w0_ref.dtype)
    n1 = (c1 * inv).astype(w1_ref.dtype)
    acc = jnp.dot(n0, w0_ref[...], preferred_element_type=jnp.float32)
    acc = acc + jnp.dot(n1, w1_ref[...], preferred_element_type=jnp.float32)
    acc = acc + b_ref[...].astype(jnp.float32)

    o_ref[...] = acc.reshape(tg, w2, -1).astype(o_ref.dtype)


# --------------------------------------------------------------------------- #
# VMEM sizing
# --------------------------------------------------------------------------- #
def _vmem_cap_bytes():
    """Physical per-core VMEM (v7x: 64 MiB); clamp target for the limit."""
    try:
        cap = getattr(pltpu.get_tpu_info(), "vmem_capacity_bytes", None)
        if cap:
            return int(cap)
    except Exception:
        pass
    return 64 << 20


def _vmem_limit_bytes(tg, w2, two_c, coutp, x_bytes, w_bytes, o_bytes):
    blk_in = tg * 2 * w2 * two_c               # both hp-halves of one step
    blk_out = tg * w2 * coutp
    need = 2 * blk_in * x_bytes                # input block, double-buffered
    need += 2 * blk_out * o_bytes              # output block, double-buffered
    need += 2 * 2 * two_c * coutp * w_bytes    # W0 + W1 (constant index_map)
    need += 2 * coutp * 4                      # bias
    need += 3 * blk_in * 4                     # live f32 LN temps (h, c, n)
    need += 2 * blk_out * 4                    # f32 accumulator + pre-cast out
    need += 2 << 20                            # mosaic internal scratch slack
    cap = _vmem_cap_bytes()
    return int(min(max(need, 16 << 20), cap - (4 << 20)))


# --------------------------------------------------------------------------- #
# pallas_call wrapper
# --------------------------------------------------------------------------- #
def _merge_ln_reduce(x4, w0, w1, bias, *, eps, row_tile):
    """x4: (G, 2, W2, 2C) zero-copy view of the padded NHWC input.
    Returns (G, W2, Coutp)."""
    G, _, W2, two_c = x4.shape
    coutp = w0.shape[1]

    # ~row_tile output rows per grid step; force >=2 steps so the "parallel"
    # axis can shard across both v7x TensorCores (no-op on v5e/v6e).
    tg_req = max(1, row_tile // max(W2, 1))
    tg = max(1, min(tg_req, pl.cdiv(G, 2)))
    grid = (pl.cdiv(G, tg),)

    R = G * W2
    cost = pl.CostEstimate(
        flops=2 * R * (2 * two_c) * coutp + 10 * R * (2 * two_c),
        transcendentals=R,
        bytes_accessed=(x4.size * x4.dtype.itemsize
                        + R * coutp * x4.dtype.itemsize
                        + 2 * two_c * coutp * w0.dtype.itemsize
                        + coutp * 4),
    )

    return pl.pallas_call(
        functools.partial(_merge_ln_reduce_kernel,
                          eps=eps, inv_4c=1.0 / (2.0 * two_c)),
        out_shape=jax.ShapeDtypeStruct((G, W2, coutp), x4.dtype),
        grid_spec=pltpu.PrefetchScalarGridSpec(
            num_scalar_prefetch=0,
            grid=grid,
            in_specs=[
                pl.BlockSpec((tg, 2, W2, two_c), lambda i: (i, 0, 0, 0)),
                pl.BlockSpec((two_c, coutp), lambda i: (0, 0)),
                pl.BlockSpec((two_c, coutp), lambda i: (0, 0)),
                pl.BlockSpec((1, coutp), lambda i: (0, 0)),
            ],
            out_specs=pl.BlockSpec((tg, W2, coutp), lambda i: (i, 0, 0)),
        ),
        compiler_params=pltpu.CompilerParams(
            dimension_semantics=("parallel",),
            vmem_limit_bytes=_vmem_limit_bytes(
                tg, W2, two_c, coutp,
                x4.dtype.itemsize, w0.dtype.itemsize, x4.dtype.itemsize)),
        cost_estimate=cost,
    )(x4, w0, w1, bias)


@functools.partial(
    jax.jit,
    static_argnames=("channel_first", "eps", "row_tile", "mxu_dtype"))
def patch_merging_2d(x, params, channel_first=False, eps=1e-5, row_tile=2048,
                     mxu_dtype=None):
    """PatchMerging2D forward.

    channel_first=False: x (B, H, W, C)  -> (B, H/2, W/2, out_dim)
    channel_first=True : x (B, C, H, W)  -> (B, out_dim, H/2, W/2)
    params = (gamma (4C,), beta (4C,), w_reduction (4C, out_dim))  [w is the
    transpose of torch's reduction.weight; reduction has no bias].
    """
    gamma, beta, w_red = params

    if channel_first:
        # TODO(synk): PyTorch's channel_first branch pads C/H (not H/W) and
        # applies LayerNorm over the trailing dim of an NCHW tensor, which is
        # inconsistent upstream; we implement the intended channel-wise
        # semantics (normalise over 4C) here.
        x = jnp.transpose(x, (0, 2, 3, 1))

    B, H, W, C = x.shape
    four_c = 4 * C
    if (H % 2) or (W % 2):
        x = jnp.pad(x, ((0, 0), (0, H % 2), (0, W % 2), (0, 0)))
    Hp, Wp = x.shape[1], x.shape[2]
    H2, W2 = Hp // 2, Wp // 2
    G = B * H2
    two_c = 2 * C
    cout = w_red.shape[1]

    # Zero-copy (bitcast) view: (B,Hp,Wp,C) -> (B*H2, 2, W2, 2C).
    # hp=0 rows hold the [x0 | x2] channels, hp=1 rows hold [x1 | x3].
    x4 = x.reshape(G, 2, W2, two_c)

    # Fold LN affine into the reduction weight and permute its rows to match
    # the in-kernel (free) channel order.  torch channel order is
    # [x0 | x1 | x2 | x3] along 4C.
    gw = (gamma.astype(jnp.float32)[:, None]
          * w_red.astype(jnp.float32)).reshape(4, C, cout)
    w0 = jnp.concatenate([gw[0], gw[2]], axis=0)          # (2C, cout) for h0
    w1 = jnp.concatenate([gw[1], gw[3]], axis=0)          # (2C, cout) for h1
    bias = (beta.astype(jnp.float32)
            @ w_red.astype(jnp.float32)).reshape(1, cout)

    # Lane-dense output: pad out_dim to a multiple of 128 with zero weight
    # columns when the extra output bytes are cheap (<= ~33%); slice outside.
    pad = (-cout) % 128
    coutp = cout + pad if (pad and 3 * pad <= cout) else cout
    if coutp != cout:
        w0 = jnp.pad(w0, ((0, 0), (0, coutp - cout)))
        w1 = jnp.pad(w1, ((0, 0), (0, coutp - cout)))
        bias = jnp.pad(bias, ((0, 0), (0, coutp - cout)))

    if mxu_dtype is not None:
        w0 = w0.astype(mxu_dtype)
        w1 = w1.astype(mxu_dtype)

    out_rows = _merge_ln_reduce(x4, w0, w1, bias,
                                eps=float(eps), row_tile=int(row_tile))
    if coutp != cout:
        out_rows = out_rows[..., :cout]

    out = out_rows.reshape(B, H2, W2, cout)
    if channel_first:
        out = jnp.transpose(out, (0, 3, 1, 2))
    return out


# --------------------------------------------------------------------------- #
# Params + pure-JAX reference
# --------------------------------------------------------------------------- #
def init_patch_merging_params(key, dim, out_dim=-1, dtype=jnp.float32):
    """Deterministic synthetic parameters for PatchMerging2D(dim, out_dim)."""
    out_dim = 2 * dim if out_dim < 0 else out_dim
    four_c = 4 * dim
    kg, kb, kw = jax.random.split(key, 3)
    # Random affine (instead of torch's ones/zeros) so the affine path is tested.
    gamma = (1.0 + 0.1 * jax.random.normal(kg, (four_c,))).astype(dtype)
    beta = (0.1 * jax.random.normal(kb, (four_c,))).astype(dtype)
    lim = 1.0 / (four_c ** 0.5)
    # Stored pre-transposed relative to torch: (4C, out_dim).
    w = jax.random.uniform(kw, (four_c, out_dim), dtype, -lim, lim)
    return gamma, beta, w


def _reference_channel_last(x, params, eps=1e-5):
    """Pure-JAX reference mirroring the PyTorch forward (channel_last)."""
    gamma, beta, w = params
    B, H, W, C = x.shape
    if (H % 2) or (W % 2):
        x = jnp.pad(x, ((0, 0), (0, H % 2), (0, W % 2), (0, 0)))
    x0 = x[:, 0::2, 0::2, :]
    x1 = x[:, 1::2, 0::2, :]
    x2 = x[:, 0::2, 1::2, :]
    x3 = x[:, 1::2, 1::2, :]
    m = jnp.concatenate([x0, x1, x2, x3], axis=-1)
    mu = jnp.mean(m, axis=-1, keepdims=True)
    var = jnp.mean((m - mu) ** 2, axis=-1, keepdims=True)
    y = (m - mu) / jnp.sqrt(var + eps) * gamma + beta
    return y @ w


# --------------------------------------------------------------------------- #
# Tests
# --------------------------------------------------------------------------- #
if __name__ == "__main__":
    key = jax.random.PRNGKey(0)
    kx, kp = jax.random.split(key)

    B, H, W, dim = 2, 16, 16, 4
    out_dim = 2 * dim
    x = jax.random.normal(kx, (B, H, W, dim), jnp.float32)
    params = init_patch_merging_params(kp, dim)
    ref = _reference_channel_last(x, params)

    # channel_last (module default), f32
    out = jax.block_until_ready(patch_merging_2d(x, params))
    assert out.shape == (B, H // 2, W // 2, out_dim)
    assert jnp.allclose(out, ref, atol=1e-4, rtol=1e-4)

    # bf16-fed MXU (f32 LayerNorm stats + f32 accumulation)
    out_mxu = jax.block_until_ready(
        patch_merging_2d(x, params, mxu_dtype=jnp.bfloat16))
    assert jnp.allclose(out_mxu, ref, atol=5e-2, rtol=5e-2)

    # bf16 activations end-to-end (halves HBM traffic on the dominant stream)
    out_b16 = jax.block_until_ready(
        patch_merging_2d(x.astype(jnp.bfloat16), params,
                         mxu_dtype=jnp.bfloat16))
    assert jnp.allclose(out_b16.astype(jnp.float32), ref, atol=1e-1, rtol=1e-1)

    # channel_first (NCHW) path
    x_cf = jnp.transpose(x, (0, 3, 1, 2))
    out_cf = jax.block_until_ready(
        patch_merging_2d(x_cf, params, channel_first=True))
    assert out_cf.shape == (B, out_dim, H // 2, W // 2)
    assert jnp.allclose(jnp.transpose(out_cf, (0, 2, 3, 1)), ref,
                        atol=1e-4, rtol=1e-4)

    # odd spatial dims exercise the pad-to-even branch
    x_odd = jax.random.normal(kx, (B, 15, 17, dim), jnp.float32)
    out_odd = jax.block_until_ready(patch_merging_2d(x_odd, params))
    assert out_odd.shape == (B, 8, 9, out_dim)
    ref_odd = _reference_channel_last(x_odd, params)
    assert jnp.allclose(out_odd, ref_odd, atol=1e-4, rtol=1e-4)

    # non-divisible row-block count exercises the ragged last grid step
    x_rag = jax.random.normal(kx, (3, 10, 12, dim), jnp.float32)
    out_rag = jax.block_until_ready(patch_merging_2d(x_rag, params))
    assert out_rag.shape == (3, 5, 6, out_dim)
    ref_rag = _reference_channel_last(x_rag, params)
    assert jnp.allclose(out_rag, ref_rag, atol=1e-4, rtol=1e-4)

    print("KERNEL_OK")
</pallas_src>

<mosaic_0001>
module attributes {stable_mosaic.version = 11 : i64} {
  func.func @_merge_ln_reduce_kernel(%arg0: i32, %arg1: memref<8x2x8x8xf32, #tpu.memory_space<vmem>>, %arg2: memref<8x8xf32, #tpu.memory_space<vmem>>, %arg3: memref<8x8xf32, #tpu.memory_space<vmem>>, %arg4: memref<1x8xf32, #tpu.memory_space<vmem>>, %arg5: memref<8x8x8xf32, #tpu.memory_space<vmem>>) attributes {dimension_semantics = [#tpu.dimension_semantics<parallel>], iteration_bounds = array<i64: 2>, scalar_prefetch = 0 : i64, scratch_operands = 0 : i64, tpu.core_type = #tpu.core_type<tc>, window_params = [{transform_indices = @transform_0, window_bounds = array<i64: 8, 2, 8, 8>}, {pipeline_mode = #tpu.pipeline_mode<synchronous>, transform_indices = @transform_1, window_bounds = array<i64: 8, 8>}, {pipeline_mode = #tpu.pipeline_mode<synchronous>, transform_indices = @transform_2, window_bounds = array<i64: 8, 8>}, {pipeline_mode = #tpu.pipeline_mode<synchronous>, transform_indices = @transform_3, window_bounds = array<i64: 1, 8>}, {transform_indices = @transform_4, window_bounds = array<i64: 8, 8, 8>}]} {
    %c0 = arith.constant 0 : index
    %c0_0 = arith.constant 0 : index
    %c0_1 = arith.constant 0 : index
    %c0_2 = arith.constant 0 : index
    %0 = vector.load %arg1[%c0, %c0_0, %c0_1, %c0_2] : memref<8x2x8x8xf32, #tpu.memory_space<vmem>>, vector<8x2x8x8xf32>
    %1 = vector.extract_strided_slice %0 {offsets = [0, 0, 0, 0], sizes = [8, 1, 8, 8], strides = [1, 1, 1, 1]} : vector<8x2x8x8xf32> to vector<8x1x8x8xf32>
    %2 = vector.shape_cast %1 : vector<8x1x8x8xf32> to vector<8x8x8xf32>
    %3 = vector.shape_cast %2 : vector<8x8x8xf32> to vector<64x8xf32>
    %4 = vector.extract_strided_slice %0 {offsets = [0, 1, 0, 0], sizes = [8, 1, 8, 8], strides = [1, 1, 1, 1]} : vector<8x2x8x8xf32> to vector<8x1x8x8xf32>
    %5 = vector.shape_cast %4 : vector<8x1x8x8xf32> to vector<8x8x8xf32>
    %6 = vector.shape_cast %5 : vector<8x8x8xf32> to vector<64x8xf32>
    %cst = arith.constant dense<0.000000e+00> : vector<64xf32>
    %7 = vector.multi_reduction <add>, %3, %cst [1] : vector<64x8xf32> to vector<64xf32>
    %8 = vector.shape_cast %7 : vector<64xf32> to vector<64x1xf32>
    %cst_3 = arith.constant dense<0.000000e+00> : vector<64xf32>
    %9 = vector.multi_reduction <add>, %6, %cst_3 [1] : vector<64x8xf32> to vector<64xf32>
    %10 = vector.shape_cast %9 : vector<64xf32> to vector<64x1xf32>
    %11 = arith.addf %8, %10 : vector<64x1xf32>
    %cst_4 = arith.constant 6.250000e-02 : f32
    %12 = vector.broadcast %cst_4 : f32 to vector<64x1xf32>
    %13 = arith.mulf %11, %12 : vector<64x1xf32>
    %14 = vector.broadcast %13 : vector<64x1xf32> to vector<64x8xf32>
    %15 = arith.subf %3, %14 : vector<64x8xf32>
    %16 = vector.broadcast %13 : vector<64x1xf32> to vector<64x8xf32>
    %17 = arith.subf %6, %16 : vector<64x8xf32>
    %18 = arith.mulf %15, %15 : vector<64x8xf32>
    %cst_5 = arith.constant dense<0.000000e+00> : vector<64xf32>
    %19 = vector.multi_reduction <add>, %18, %cst_5 [1] : vector<64x8xf32> to vector<64xf32>
    %20 = vector.shape_cast %19 : vector<64xf32> to vector<64x1xf32>
    %21 = arith.mulf %17, %17 : vector<64x8xf32>
    %cst_6 = arith.constant dense<0.000000e+00> : vector<64xf32>
    %22 = vector.multi_reduction <add>, %21, %cst_6 [1] : vector<64x8xf32> to vector<64xf32>
    %23 = vector.shape_cast %22 : vector<64xf32> to vector<64x1xf32>
    %24 = arith.addf %20, %23 : vector<64x1xf32>
    %cst_7 = arith.constant 6.250000e-02 : f32
    %25 = vector.broadcast %cst_7 : f32 to vector<64x1xf32>
    %26 = arith.mulf %24, %25 : vector<64x1xf32>
    %cst_8 = arith.constant 9.99999974E-6 : f32
    %27 = vector.broadcast %cst_8 : f32 to vector<64x1xf32>
    %28 = arith.addf %26, %27 : vector<64x1xf32>
    %29 = math.rsqrt %28 : vector<64x1xf32>
    %30 = vector.broadcast %29 : vector<64x1xf32> to vector<64x8xf32>
    %31 = arith.mulf %15, %30 : vector<64x8xf32>
    %32 = vector.broadcast %29 : vector<64x1xf32> to vector<64x8xf32>
    %33 = arith.mulf %17, %32 : vector<64x8xf32>
    %c0_9 = arith.constant 0 : index
    %c0_10 = arith.constant 0 : index
    %34 = vector.load %arg2[%c0_9, %c0_10] : memref<8x8xf32, #tpu.memory_space<vmem>>, vector<8x8xf32>
    %cst_11 = arith.constant dense<0.000000e+00> : vector<64x8xf32>
    %35 = tpu.matmul %31, %34, %cst_11 {dimension_numbers = #tpu.dot_dimension_numbers<[1], [0], [0], [1], [0, 0, 1, 1], [], []>} : vector<64x8xf32>, vector<8x8xf32>, vector<64x8xf32> -> vector<64x8xf32>
    %c0_12 = arith.constant 0 : index
    %c0_13 = arith.constant 0 : index
    %36 = vector.load %arg3[%c0_12, %c0_13] : memref<8x8xf32, #tpu.memory_space<vmem>>, vector<8x8xf32>
    %cst_14 = arith.constant dense<0.000000e+00> : vector<64x8xf32>
    %37 = tpu.matmul %33, %36, %cst_14 {dimension_numbers = #tpu.dot_dimension_numbers<[1], [0], [0], [1], [0, 0, 1, 1], [], []>} : vector<64x8xf32>, vector<8x8xf32>, vector<64x8xf32> -> vector<64x8xf32>
    %38 = arith.addf %35, %37 : vector<64x8xf32>
    %c0_15 = arith.constant 0 : index
    %c0_16 = arith.constant 0 : index
    %39 = vector.load %arg4[%c0_15, %c0_16] : memref<1x8xf32, #tpu.memory_space<vmem>>, vector<1x8xf32>
    %40 = vector.broadcast %39 : vector<1x8xf32> to vector<64x8xf32>
    %41 = arith.addf %38, %40 : vector<64x8xf32>
    %42 = vector.shape_cast %41 : vector<64x8xf32> to vector<8x8x8xf32>
    %c0_17 = arith.constant 0 : index
    %c0_18 = arith.constant 0 : index
    %c0_19 = arith.constant 0 : index
    %43 = vector.load %arg5[%c0_17, %c0_18, %c0_19] : memref<8x8x8xf32, #tpu.memory_space<vmem>>, vector<8x8x8xf32>
    tpu.vector_store %arg5[%c0_17, %c0_18, %c0_19], %42 {strides = array<i32>} : memref<8x8x8xf32, #tpu.memory_space<vmem>>, vector<8x8x8xf32>,
    return
  }
  func.func @transform_0(%arg0: i32) -> (i32, i32, i32, i32) {
    %c0_i32 = arith.constant 0 : i32
    %c0_i32_0 = arith.constant 0 : i32
    %c0_i32_1 = arith.constant 0 : i32
    %c0_i32_2 = arith.constant 0 : i32
    return %arg0, %c0_i32, %c0_i32_0, %c0_i32_1 : i32, i32, i32, i32
  }
  func.func @transform_1(%arg0: i32) -> (i32, i32) {
    %c0_i32 = arith.constant 0 : i32
    %c0_i32_0 = arith.constant 0 : i32
    %c0_i32_1 = arith.constant 0 : i32
    return %c0_i32, %c0_i32_0 : i32, i32
  }
  func.func @transform_2(%arg0: i32) -> (i32, i32) {
    %c0_i32 = arith.constant 0 : i32
    %c0_i32_0 = arith.constant 0 : i32
    %c0_i32_1 = arith.constant 0 : i32
    return %c0_i32, %c0_i32_0 : i32, i32
  }
  func.func @transform_3(%arg0: i32) -> (i32, i32) {
    %c0_i32 = arith.constant 0 : i32
    %c0_i32_0 = arith.constant 0 : i32
    %c0_i32_1 = arith.constant 0 : i32
    return %c0_i32, %c0_i32_0 : i32, i32
  }
  func.func @transform_4(%arg0: i32) -> (i32, i32, i32) {
    %c0_i32 = arith.constant 0 : i32
    %c0_i32_0 = arith.constant 0 : i32
    %c0_i32_1 = arith.constant 0 : i32
    return %arg0, %c0_i32, %c0_i32_0 : i32, i32, i32
  }
}

</mosaic_0001>

<bundles_post_ra>
// kernel: patch_merging_2d.1
= control target key start
LH: loop header
LB: loop body
LE: loop exit
PB: predicated region body
PF: predicated region fallthrough
CT: control target
= control target key end

     0   :  { %9 = vsyncpa [#allocation3], 0  ;;  %s1329_s0 = inlined_call_operand.vmem [shape: f32[16,2,8,8], index: 0, kind: input, shape index: {}]   ;;  %s1330_s1 = inlined_call_operand.vmem [shape: f32[8,8], index: 1, kind: input, shape index: {}]   ;;  %s1331_s2 = inlined_call_operand.vmem [shape: f32[8,8], index: 2, kind: input, shape index: {}]   ;;  %s1332_s3 = inlined_call_operand.vmem [shape: f32[1,8], index: 3, kind: input, shape index: {}]   ;;  %s1333_s4 = inlined_call_operand.hbm [shape: f32[16,8,8], index: 4, kind: output, shape index: {}]  }
   0x1   :  { %11 = vsyncpa [#allocation3 + $0x1], 0  ;;  %s1005_s15 = smov 0   ;;  %s1007_s16 = smov 0  }
   0x2   :  { %s1009_s17 = smov 0   ;;  %s1011_s18 = smov 0  }
   0x3 LB: > { %s1026_s19 = sadd.s32 4294967295, %s975_s18   ;;  %s770_s20 = sadd.s32 4294967294, %s975_s18   ;;  %s975_s18 = sphi %s1011_s18, %s1339_s18   ;;  %s971_s17 = sphi %s1009_s17, %s1338_s17   ;;  %s967_s16 = sphi %s1007_s16, %s1337_s16   ;;  %s963_s15 = sphi %s1005_s15, %s1336_s15  }
   0x4   : > { %s1030_s21 = sadd.s32 1, %s975_s18   ;;  %s113_s22 = sadd.s32 1, %s971_s17 }
   0x5   : > { %s110_s23 = ssub.s32 %s975_s18, %s1030_s21  ;;  %p123_p0 = scmp.ne.s32.totalorder %s971_s17, %s967_s16 }
   0x6   : > { %p111_p1 = scmp.eq.s32.totalorder %s110_s23, 0  ;;  %p124_p2 = scmp.eq.s32.totalorder %s1026_s19, 1 }
   0x7   : > { %p129_p3 = scmp.ne.s32.totalorder %s967_s16, %s963_s15  ;;  %p130_p4 = scmp.eq.s32.totalorder %s770_s20, 1 }
   0x8   : > { %s1041_s24 = scalar_select %p111_p1, %s971_s17, %s113_s22  }
   0x9   : > { %p1043_p5 = por %p124_p2, %p123_p0  ;;  %p1047_p6 = por %p130_p4, %p129_p3 }
   0xa   : > { %p773_p7 = scmp.ge.s32.totalorder %s975_s18, 1  ;;  %p167_p8 = scmp.lt.s32.totalorder %s975_s18, 3 }
   0xc   : > { %p168_p9 = pnand %p773_p7, %p167_p8 }
   0xd   : > { %s775_s27 = sshll.u32 (!%p168_p9), %s1026_s19, 3  ;;  %vm218_vm0 = vcmask (!%p168_p9), 64512   ;;  %s191_s10 = sand.u32 (!%p168_p9), 1, %s967_s16  }
   0xe   : > { %171 = sbr.rel (%p168_p9) target bundleno = 602 (0x25a), region = 36  ;;  %p195_p10 = scmp.lt.s32.totalorder (!%p168_p9), %s775_s27, 15 }
   0xf   : > { %s774_s11 = sshll.u32 (!%p168_p9), %s191_s10, 6  ;;  %s801_s20 = sshll.u32 (!%p168_p9), %s1026_s19, 10 }
  0x10   : > { %s1259_s14 = scalar_lea.vmem (!%p168_p9), [#allocation2], %s774_s11  ;;  %s1288_s19 = scalar_lea.sflag (!%p168_p9), [#allocation3], %s191_s10 }
  0x11   : > { %s708_s22 = sshll.u32 (!%p168_p9), %s1259_s14, 4  ;;  %s977_s30 = smov (!%p168_p9), [#allocation2]   ;;  %s1280_s22 = int_to_ptr.vmem [resolvable:$true] %s708_s22 }
  0x12   : > { %s913_s29 = scalar_lea.vmem (!%p168_p9), %s1280_s22, 1024 }
  0x13   : > { %p914_p11 = scmp.ne.s32.totalorder (!%p168_p9), %s1280_s22, %s913_s29 }
  0x15   : > { %s1341_s27 = smov (!%p195_p10, %s775_s27), 15  ;;  %p915_p12 = pnand %p914_p11, %p1043_p5 }
  0x16   : > { %s800_s28 = sshll.u32 %s1341_s27, 4 }
  0x17   : > { %s1057_s5 = scalar_lea.vmem %s1329_s0, %s800_s28  ;;  %s1278_s28 = scalar_lea.hbm %s1333_s4, %s801_s20 }
  0x18   : > { %v204_v0 = vld [vmem:[%s1057_s5 + $0x10] sm:$0xff]  ;;  %v202_v1 = vld [vmem:[%s1057_s5] sm:$0xff]  ;;  %v205_v2 = vld [vmem:[%s1057_s5 + $0x18] sm:$0xff]  ;;  %p916_p13 = pneg %p915_p12 }
  0x19   : > { %v222_v3 = vsel %vm218_vm0, %v204_v0, 0.0  ;;  %v219_v4 = vsel %vm218_vm0, %v202_v1, 0.0  ;;  %v203_v5 = vld [vmem:[%s1057_s5 + $0x8] sm:$0xff]  ;;  %v246_v6 = vsel %vm218_vm0, %v205_v2, 0.0  ;;  %v206_v9 = vld [vmem:[%s1057_s5 + $0x20] sm:$0xff]  ;;  %v1075_v12 = vld [vmem:[%s1057_s5 + $0x38] sm:$0xff] }
  0x1a   : > { %223 = vadd.xlane.f32.xlu1 %v222_v3  ;;  %220 = vadd.xlane.f32.xlu0 %v219_v4  ;;  %v243_v7 = vsel %vm218_vm0, %v203_v5, 0.0  ;;  %v1068_v8 = vld [vmem:[%s1057_s5 + $0x28] sm:$0xff]  ;;  %v225_v11 = vsel %vm218_vm0, %v206_v9, 0.0  ;;  %v1078_v13 = vld [vmem:[%s1057_s5 + $0x30] sm:$0xff]  ;;  %v252_v14 = vsel %vm218_vm0, %v1075_v12, 0.0  ;;  %v1088_v17 = vld [vmem:[%s1057_s5 + $0x40] sm:$0xff] }
  0x1b   : > { %v249_v10 = vsel %vm218_vm0, %v1068_v8, 0.0  ;;  %v228_v15 = vsel %vm218_vm0, %v1078_v13, 0.0  ;;  %v1085_v16 = vld [vmem:[%s1057_s5 + $0x48] sm:$0xff]  ;;  %v231_v19 = vsel %vm218_vm0, %v1088_v17, 0.0  ;;  %v1095_v20 = vld [vmem:[%s1057_s5 + $0x58] sm:$0xff]  ;;  %v1098_v21 = vld [vmem:[%s1057_s5 + $0x50] sm:$0xff] }
  0x1c   : > { %v255_v18 = vsel %vm218_vm0, %v1085_v16, 0.0  ;;  %v258_v22 = vsel %vm218_vm0, %v1095_v20, 0.0  ;;  %v234_v23 = vsel %vm218_vm0, %v1098_v21, 0.0  ;;  %v1105_v24 = vld [vmem:[%s1057_s5 + $0x68] sm:$0xff]  ;;  %v1108_v25 = vld [vmem:[%s1057_s5 + $0x60] sm:$0xff]  ;;  %v1115_v28 = vld [vmem:[%s1057_s5 + $0x78] sm:$0xff] }
  0x1d   : > { %v261_v26 = vsel %vm218_vm0, %v1105_v24, 0.0  ;;  %v237_v27 = vsel %vm218_vm0, %v1108_v25, 0.0  ;;  %v1118_v29 = vld [vmem:[%s1057_s5 + $0x70] sm:$0xff]  ;;  %v264_v30 = vsel %vm218_vm0, %v1115_v28, 0.0  ;;  %s917_s5 = sshll.u32 %s977_s30, 4  ;;  %s918_s5 = int_to_ptr.vmem [resolvable:$false] %s917_s5 }
  0x1e   : > { %247 = vadd.xlane.f32.xlu1 %v246_v6  ;;  %244 = vadd.xlane.f32.xlu0 %v243_v7  ;;  %v240_v31 = vsel %vm218_vm0, %v1118_v29, 0.0  ;;  %s919_s6 = scalar_lea.vmem %s918_s5, 2048  ;;  %p920_p0 = scmp.lt.s32.totalorder %s1280_s22, %s918_s5 }
  0x1f   : > { %p921_p1 = scmp.lt.s32.totalorder %s919_s6, %s913_s29 }
  0x21   : > { %p922_p2 = por %p921_p1, %p920_p0 }
  0x22   : > { %250 = vadd.xlane.f32.xlu1 %v249_v10  ;;  %226 = vadd.xlane.f32.xlu0 %v225_v11 }
  0x23   : > { %p923_p3 = pnand %p922_p2, %p916_p13 }
  0x26   : > { %253 = vadd.xlane.f32.xlu1 %v252_v14  ;;  %229 = vadd.xlane.f32.xlu0 %v228_v15 }
  0x2a   : > { %256 = vadd.xlane.f32.xlu1 %v255_v18  ;;  %232 = vadd.xlane.f32.xlu0 %v231_v19 }
  0x2e   : > { %259 = vadd.xlane.f32.xlu1 %v258_v22  ;;  %235 = vadd.xlane.f32.xlu0 %v234_v23 }
  0x32   : > { %262 = vadd.xlane.f32.xlu1 %v261_v26  ;;  %238 = vadd.xlane.f32.xlu0 %v237_v27 }
  0x36   : > { %265 = vadd.xlane.f32.xlu1 %v264_v30  ;;  %241 = vadd.xlane.f32.xlu0 %v240_v31 }
  0xa7   : > { %v224_v32 = vpop.xlane.xlu1 %223  ;;  %v221_v33 = vpop.xlane.xlu0 %220 }
  0xab   : > { %v248_v34 = vpop.xlane.xlu1 %247  ;;  %v245_v35 = vpop.xlane.xlu0 %244 }
  0xac   : > { %v268_v36 = vadd.f32 %v248_v34, %v224_v32  ;;  %v267_v37 = vadd.f32 %v245_v35, %v221_v33 }
  0xae   : > { %v276_v38 = vmul.f32 0.0625, %v268_v36  ;;  %v275_v39 = vmul.f32 0.0625, %v267_v37 }
  0xaf   : > { %v251_v40 = vpop.xlane.xlu1 %250  ;;  %v227_v41 = vpop.xlane.xlu0 %226 }
  0xb0   : > { %v1124_v42 = vsub.f32 %v204_v0, %v276_v38  ;;  %v1126_v43 = vsub.f32 %v205_v2, %v276_v38  ;;  %v1128_v44 = vsub.f32 %v202_v1, %v275_v39  ;;  %v1130_v45 = vsub.f32 %v203_v5, %v275_v39 }
  0xb1   : > { %v269_v46 = vadd.f32 %v251_v40, %v227_v41 }
  0xb2   : > { %v331_v47 = vmul.f32 %v1130_v45, %v1130_v45  ;;  %v299_v48 = vmul.f32 %v1128_v44, %v1128_v44  ;;  %v332_v52 = vmul.f32 %v1126_v43, %v1126_v43  ;;  %v300_v56 = vmul.f32 %v1124_v42, %v1124_v42 }
  0xb3   : > { %v277_v49 = vmul.f32 0.0625, %v269_v46  ;;  %v254_v50 = vpop.xlane.xlu1 %253  ;;  %v230_v51 = vpop.xlane.xlu0 %229 }
  0xb4   : > { %v339_v53 = vsel %vm218_vm0, %v331_v47, 0.0  ;;  %v307_v54 = vsel %vm218_vm0, %v299_v48, 0.0  ;;  %v270_v55 = vadd.f32 %v254_v50, %v230_v51  ;;  %v342_v60 = vsel %vm218_vm0, %v332_v52, 0.0 }
  0xb5   : > { %v1142_v57 = vsub.f32 %v206_v9, %v277_v49  ;;  %v1145_v58 = vsub.f32 %v1068_v8, %v277_v49  ;;  %340 = vadd.xlane.f32.xlu1 %v339_v53  ;;  %308 = vadd.xlane.f32.xlu0 %v307_v54  ;;  %v310_v3 = vsel %vm218_vm0, %v300_v56, 0.0  ;;  %v411_v53 = vld [vmem:[%s1330_s1] sm:$0xff] }
  0xb6   : > { %v278_v59 = vmul.f32 0.0625, %v270_v55  ;;  %834 = vmatprep.subr.mxu0 %v411_v53 }
  0xb7   : > { %v257_v61 = vpop.xlane.xlu1 %256  ;;  %v233_v62 = vpop.xlane.xlu0 %232  ;;  %v333_v63 = vmul.f32 %v1145_v58, %v1145_v58  ;;  %v301_v0 = vmul.f32 %v1142_v57, %v1142_v57  ;;  %835 = vmatpush3.msra.mxu0 %v411_v53 }
  0xb8   : > { %v1153_v1 = vsub.f32 %v1078_v13, %v278_v59  ;;  %v1156_v2 = vsub.f32 %v1075_v12, %v278_v59  ;;  %v271_v4 = vadd.f32 %v257_v61, %v233_v62 }
  0xb9   : > { %343 = vadd.xlane.f32.xlu1 %v342_v60  ;;  %311 = vadd.xlane.f32.xlu0 %v310_v3  ;;  %v345_v5 = vsel %vm218_vm0, %v333_v63, 0.0  ;;  %v313_v7 = vsel %vm218_vm0, %v301_v0, 0.0 }
  0xba   : > { %v279_v6 = vmul.f32 0.0625, %v271_v4  ;;  %v334_v8 = vmul.f32 %v1156_v2, %v1156_v2  ;;  %v302_v9 = vmul.f32 %v1153_v1, %v1153_v1 }
  0xbb   : > { %v260_v10 = vpop.xlane.xlu1 %259  ;;  %v236_v11 = vpop.xlane.xlu0 %235 }
  0xbc   : > { %v1166_v12 = vsub.f32 %v1088_v17, %v279_v6  ;;  %v1169_v13 = vsub.f32 %v1085_v16, %v279_v6  ;;  %v272_v14 = vadd.f32 %v260_v10, %v236_v11  ;;  %v348_v15 = vsel %vm218_vm0, %v334_v8, 0.0 }
  0xbd   : > { %346 = vadd.xlane.f32.xlu1 %v345_v5  ;;  %314 = vadd.xlane.f32.xlu0 %v313_v7  ;;  %v316_v19 = vsel %vm218_vm0, %v302_v9, 0.0 }
  0xbe   : > { %v280_v18 = vmul.f32 0.0625, %v272_v14  ;;  %v335_v22 = vmul.f32 %v1169_v13, %v1169_v13  ;;  %v303_v23 = vmul.f32 %v1166_v12, %v1166_v12 }
  0xbf   : > { %v263_v26 = vpop.xlane.xlu1 %262  ;;  %v239_v17 = vpop.xlane.xlu0 %238 }
  0xc0   : > { %v1178_v27 = vsub.f32 %v1098_v21, %v280_v18  ;;  %v1181_v16 = vsub.f32 %v1095_v20, %v280_v18  ;;  %v273_v30 = vadd.f32 %v263_v26, %v239_v17  ;;  %v351_v31 = vsel %vm218_vm0, %v335_v22, 0.0 }
  0xc1   : > { %349 = vadd.xlane.f32.xlu1 %v348_v15  ;;  %317 = vadd.xlane.f32.xlu0 %v316_v19  ;;  %v319_v33 = vsel %vm218_vm0, %v303_v23, 0.0 }
  0xc2   : > { %v281_v32 = vmul.f32 0.0625, %v273_v30  ;;  %v336_v34 = vmul.f32 %v1181_v16, %v1181_v16  ;;  %v304_v35 = vmul.f32 %v1178_v27, %v1178_v27 }
  0xc3   : > { %v266_v36 = vpop.xlane.xlu1 %265  ;;  %v242_v21 = vpop.xlane.xlu0 %241 }
  0xc4   : > { %v1190_v37 = vsub.f32 %v1108_v25, %v281_v32  ;;  %v1193_v20 = vsub.f32 %v1105_v24, %v281_v32  ;;  %v274_v38 = vadd.f32 %v266_v36, %v242_v21  ;;  %v354_v39 = vsel %vm218_vm0, %v336_v34, 0.0 }
  0xc5   : > { %352 = vadd.xlane.f32.xlu1 %v351_v31  ;;  %320 = vadd.xlane.f32.xlu0 %v319_v33  ;;  %v322_v41 = vsel %vm218_vm0, %v304_v35, 0.0 }
  0xc6   : > { %v282_v40 = vmul.f32 0.0625, %v274_v38  ;;  %v337_v46 = vmul.f32 %v1193_v20, %v1193_v20  ;;  %v305_v47 = vmul.f32 %v1190_v37, %v1190_v37 }
  0xc8   : > { %v1202_v25 = vsub.f32 %v1118_v29, %v282_v40  ;;  %v1205_v24 = vsub.f32 %v1115_v28, %v282_v40  ;;  %v357_v48 = vsel %vm218_vm0, %v337_v46, 0.0  ;;  %v325_v49 = vsel %vm218_vm0, %v305_v47, 0.0  ;;  %v412_v28 = vld [vmem:[%s1331_s2] sm:$0xff] }
  0xc9   : > { %355 = vadd.xlane.f32.xlu1 %v354_v39  ;;  %323 = vadd.xlane.f32.xlu0 %v322_v41 }
  0xca   : > { %v338_v50 = vmul.f32 %v1205_v24, %v1205_v24  ;;  %v306_v51 = vmul.f32 %v1202_v25, %v1202_v25  ;;  %820 = vmatprep.subr.mxu1 %v412_v28 }
  0xcb   : > { %821 = vmatpush3.msra.mxu1 %v412_v28 }
  0xcc   : > { %v360_v29 = vsel %vm218_vm0, %v338_v50, 0.0  ;;  %v328_v52 = vsel %vm218_vm0, %v306_v51, 0.0 }
  0xcd   : > { %358 = vadd.xlane.f32.xlu1 %v357_v48  ;;  %326 = vadd.xlane.f32.xlu0 %v325_v49 }
  0xd1   : > { %361 = vadd.xlane.f32.xlu1 %v360_v29  ;;  %329 = vadd.xlane.f32.xlu0 %v328_v52 }
 0x142   : > { %v341_v54 = vpop.xlane.xlu1 %340  ;;  %v309_v55 = vpop.xlane.xlu0 %308 }
 0x143   : > { %v363_v56 = vadd.f32 %v341_v54, %v309_v55 }
 0x145   : > { %v371_v59 = vmul.f32 0.0625, %v363_v56 }
 0x146   : > { %v344_v60 = vpop.xlane.xlu1 %343  ;;  %v312_v61 = vpop.xlane.xlu0 %311 }
 0x147   : > { %v379_v62 = vadd.f32 1e-05, %v371_v59  ;;  %v364_v63 = vadd.f32 %v344_v60, %v312_v61 }
 0x149   : > { %897 = vrsqrt.f32 %v379_v62  ;;  %v372_v0 = vmul.f32 0.0625, %v364_v63 }
 0x14a   : > { %v347_v3 = vpop.xlane.xlu1 %346  ;;  %v315_v4 = vpop.xlane.xlu0 %314 }
 0x14b   : > { %v380_v5 = vadd.f32 1e-05, %v372_v0  ;;  %v365_v6 = vadd.f32 %v347_v3, %v315_v4 }
 0x14d   : > { %899 = vrsqrt.f32 %v380_v5  ;;  %v373_v7 = vmul.f32 0.0625, %v365_v6 }
 0x14e   : > { %v350_v8 = vpop.xlane.xlu1 %349  ;;  %v318_v9 = vpop.xlane.xlu0 %317 }
 0x14f   : > { %v381_v10 = vadd.f32 1e-05, %v373_v7  ;;  %v366_v11 = vadd.f32 %v350_v8, %v318_v9 }
 0x151   : > { %901 = vrsqrt.f32 %v381_v10  ;;  %v374_v14 = vmul.f32 0.0625, %v366_v11 }
 0x152   : > { %v353_v15 = vpop.xlane.xlu1 %352  ;;  %v321_v18 = vpop.xlane.xlu0 %320 }
 0x153   : > { %v898_v19 = vpop.eup %897  ;;  %v382_v22 = vadd.f32 1e-05, %v374_v14  ;;  %v367_v23 = vadd.f32 %v353_v15, %v321_v18 }
 0x154   : > { %v403_v26 = vmul.f32 %v898_v19, %v1130_v45  ;;  %v395_v17 = vmul.f32 %v898_v19, %v1128_v44 }
 0x155   : > { %903 = vrsqrt.f32 %v382_v22  ;;  %v375_v30 = vmul.f32 0.0625, %v367_v23 }
 0x156   : > { %v356_v31 = vpop.xlane.xlu1 %355  ;;  %822 = vmatprep.mubr.msk.f32.mxu1 %vm218_vm0, %v403_v26  ;;  %836 = vmatprep.mubr.msk.f32.mxu0 %vm218_vm0, %v395_v17  ;;  %v324_v32 = vpop.xlane.xlu0 %323 }
 0x157   : > { %v900_v33 = vpop.eup %899  ;;  %v383_v34 = vadd.f32 1e-05, %v375_v30  ;;  %v368_v35 = vadd.f32 %v356_v31, %v324_v32 }
 0x158   : > { %v404_v36 = vmul.f32 %v900_v33, %v1126_v43  ;;  %v396_v21 = vmul.f32 %v900_v33, %v1124_v42 }
 0x159   : > { %905 = vrsqrt.f32 %v383_v34  ;;  %v376_v38 = vmul.f32 0.0625, %v368_v35 }
 0x15a   : > { %v359_v45 = vpop.xlane.xlu1 %358  ;;  %823 = vmatmul.mubr.msk.f32.vlgmr.msra.gmra.mrb[0].mxu1 %vm218_vm0, %v404_v36  ;;  %837 = vmatmul.mubr.msk.f32.vlgmr.msra.gmra.mrb[0].mxu0 %vm218_vm0, %v396_v21  ;;  %v327_v44 = vpop.xlane.xlu0 %326 }
 0x15b   : > { %v902_v39 = vpop.eup %901  ;;  %v384_v40 = vadd.f32 1e-05, %v376_v38  ;;  %v369_v41 = vadd.f32 %v359_v45, %v327_v44 }
 0x15c   : > { %v405_v46 = vmul.f32 %v902_v39, %v1145_v58  ;;  %v397_v47 = vmul.f32 %v902_v39, %v1142_v57 }
 0x15d   : > { %907 = vrsqrt.f32 %v384_v40  ;;  %v377_v48 = vmul.f32 0.0625, %v369_v41 }
 0x15e   : > { %v362_v43 = vpop.xlane.xlu1 %361  ;;  %825 = vmatprep.mubr.msk.f32.mxu1 %vm218_vm0, %v405_v46  ;;  %839 = vmatprep.mubr.msk.f32.mxu0 %vm218_vm0, %v397_v47  ;;  %v330_v42 = vpop.xlane.xlu0 %329 }
 0x15f   : > { %v904_v49 = vpop.eup %903  ;;  %v385_v50 = vadd.f32 1e-05, %v377_v48  ;;  %v370_v51 = vadd.f32 %v362_v43, %v330_v42 }
 0x160   : > { %v406_v29 = vmul.f32 %v904_v49, %v1156_v2  ;;  %v398_v52 = vmul.f32 %v904_v49, %v1153_v1 }
 0x161   : > { %909 = vrsqrt.f32 %v385_v50  ;;  %v378_v28 = vmul.f32 0.0625, %v370_v51 }
 0x162   : > { %826 = vmatmul.mubr.msk.f32.gmra.mrb[2].mxu1 %vm218_vm0, %v406_v29  ;;  %840 = vmatmul.mubr.msk.f32.gmra.mrb[2].mxu0 %vm218_vm0, %v398_v52 }
 0x163   : > { %v906_v57 = vpop.eup %905  ;;  %v386_v58 = vadd.f32 1e-05, %v378_v28 }
 0x164   : > { %v407_v53 = vmul.f32 %v906_v57, %v1169_v13  ;;  %v399_v54 = vmul.f32 %v906_v57, %v1166_v12 }
 0x165   : > { %911 = vrsqrt.f32 %v386_v58 }
 0x166   : > { %828 = vmatprep.mubr.msk.f32.mxu1 %vm218_vm0, %v407_v53  ;;  %842 = vmatprep.mubr.msk.f32.mxu0 %vm218_vm0, %v399_v54 }
 0x167   : > { %v908_v2 = vpop.eup %907 }
 0x168   : > { %v408_v1 = vmul.f32 %v908_v2, %v1181_v16  ;;  %v400_v55 = vmul.f32 %v908_v2, %v1178_v27 }
 0x16a   : > { %829 = vmatmul.mubr.msk.f32.gmra.mrb[4].mxu1 %vm218_vm0, %v408_v1  ;;  %843 = vmatmul.mubr.msk.f32.gmra.mrb[4].mxu0 %vm218_vm0, %v400_v55 }
 0x16b   : > { %v910_v56 = vpop.eup %909 }
 0x16c   : > { %v409_v13 = vmul.f32 %v910_v56, %v1193_v20  ;;  %v401_v12 = vmul.f32 %v910_v56, %v1190_v37  ;;  %v794_v37 = vld [vmem:[%s1332_s3] ss:$0 sm:$0xff] }
 0x16e   : > { %831 = vmatprep.mubr.msk.f32.mxu1 %vm218_vm0, %v409_v13  ;;  %845 = vmatprep.mubr.msk.f32.mxu0 %vm218_vm0, %v401_v12 }
 0x16f   : > { %v912_v59 = vpop.eup %911 }
 0x170   : > { %v410_v60 = vmul.f32 %v912_v59, %v1205_v24  ;;  %v402_v16 = vmul.f32 %v912_v59, %v1202_v25 }
 0x172   : > { %832 = vmatmul.mubr.msk.f32.gmra.mrb[6].mxu1 %vm218_vm0, %v410_v60  ;;  %846 = vmatmul.mubr.msk.f32.gmra.mrb[6].mxu0 %vm218_vm0, %v402_v16 }
 0x22d   : > { %v824_v27 = vpop.f32.mrb[0].mxu1  ;;  %v838_v20 = vpop.f32.mrb[0].mxu0 }
 0x22e   : > { %v638_v61 = vadd.f32 %v838_v20, %v824_v27  ;;  %v503_v62 = vpop.f32.mrb[1].mxu1  ;;  %v632_v63 = vpop.f32.mrb[1].mxu0 }
 0x22f   : > { %v633_v0 = vadd.f32 %v632_v63, %v503_v62 }
 0x230   : > { %v679_v24 = vadd.f32 %v794_v37, %v638_v61 }
 0x231   : > { %v678_v3 = vadd.f32 %v794_v37, %v633_v0 }
 0x232   : > { %687 = vst.msk [vmem:[%s1259_s14 + $0x8] sm:$0xff] %vm218_vm0, %v679_v24 }
 0x233   : > { %686 = vst.msk [vmem:[%s1259_s14] sm:$0xff] %vm218_vm0, %v678_v3 }
 0x235   : > { %v827_v25 = vpop.f32.mrb[2].mxu1  ;;  %v841_v4 = vpop.f32.mrb[2].mxu0 }
 0x236   : > { %v648_v5 = vadd.f32 %v841_v4, %v827_v25  ;;  %v513_v6 = vpop.f32.mrb[3].mxu1  ;;  %v642_v7 = vpop.f32.mrb[3].mxu0 }
 0x237   : > { %v643_v8 = vadd.f32 %v642_v7, %v513_v6 }
 0x238   : > { %v681_v9 = vadd.f32 %v794_v37, %v648_v5 }
 0x239   : > { %v680_v10 = vadd.f32 %v794_v37, %v643_v8 }
 0x23a   : > { %689 = vst.msk [vmem:[%s1259_s14 + $0x18] sm:$0xff] %vm218_vm0, %v681_v9 }
 0x23b   : > { %688 = vst.msk [vmem:[%s1259_s14 + $0x10] sm:$0xff] %vm218_vm0, %v680_v10 }
 0x23d   : > { %v830_v11 = vpop.f32.mrb[4].mxu1  ;;  %v844_v14 = vpop.f32.mrb[4].mxu0 }
 0x23e   : > { %v658_v15 = vadd.f32 %v844_v14, %v830_v11  ;;  %v523_v18 = vpop.f32.mrb[5].mxu1  ;;  %v652_v19 = vpop.f32.mrb[5].mxu0 }
 0x23f   : > { %v653_v22 = vadd.f32 %v652_v19, %v523_v18 }
 0x240   : > { %v683_v23 = vadd.f32 %v794_v37, %v658_v15 }
 0x241   : > { %v682_v26 = vadd.f32 %v794_v37, %v653_v22 }
 0x242   : > { %691 = vst.msk [vmem:[%s1259_s14 + $0x28] sm:$0xff] %vm218_vm0, %v683_v23 }
 0x243   : > { %690 = vst.msk [vmem:[%s1259_s14 + $0x20] sm:$0xff] %vm218_vm0, %v682_v26 }
 0x245   : > { %v833_v17 = vpop.f32.mrb[6].mxu1  ;;  %v847_v30 = vpop.f32.mrb[6].mxu0 }
 0x246   : > { %v668_v31 = vadd.f32 %v847_v30, %v833_v17  ;;  %v533_v32 = vpop.f32.mrb[7].mxu1  ;;  %v662_v33 = vpop.f32.mrb[7].mxu0 }
 0x247   : > { %v663_v34 = vadd.f32 %v662_v33, %v533_v32 }
 0x248   : > { %v685_v35 = vadd.f32 %v794_v37, %v668_v31 }
 0x249   : > { %v684_v36 = vadd.f32 %v794_v37, %v663_v34 }
 0x24a   : > { %693 = vst.msk [vmem:[%s1259_s14 + $0x38] sm:$0xff] %vm218_vm0, %v685_v35 }
 0x24b   : > { %692 = vst.msk [vmem:[%s1259_s14 + $0x30] sm:$0xff] %vm218_vm0, %v684_v36 }
 0x24c   : > { %926 = shalt.err (!%p923_p3)
}
 0x24d   : > { %s927_s7 = scalar_lea.hbm %s1278_s28, 1024  ;;  %s931_s10 = scalar_lea.hbm %s1333_s4, 2048 }
 0x24e   : > { %p928_p4 = scmp.ne.s32.totalorder %s1278_s28, %s927_s7  ;;  %p932_p9 = scmp.lt.u32.totalorder %s1278_s28, %s1333_s4 }
 0x24f   : > { %p933_p10 = scmp.lt.u32.totalorder %s931_s10, %s927_s7  ;;  %p935_p12 = scmp.lt.u32.totalorder %s927_s7, %s1278_s28 }
 0x250   : > { %p929_p7 = pnand %p928_p4, %p1043_p5 }
 0x251   : > { %p934_p11 = por %p933_p10, %p932_p9 }
 0x252   : > { %p930_p8 = pneg %p929_p7 }
 0x253   : > { %p936_p13 = por %p935_p12, %p934_p11 }
 0x255   : > { %p937_p0 = pnand %p936_p13, %p930_p8 }
 0x257   : > { %940 = shalt.err (!%p937_p0)
}
 0x258   : > { %s978_s13 = smov 128   ;;  %s979_s14 = smov 8  }
 0x259   : > { %856 = dma.vmem_to_hbm [thread:$0]  (%p1043_p5), %s1280_s22, 1024, %s1278_s28, %s1288_s19, %s978_s13, %s978_s13, %s979_s14  }
 0x25a PF: > { %p862_p1 = scmp.ge.s32.totalorder %s975_s18, 2  ;;  %s723_s20 = sand.u32 1, %s963_s15  }
 0x25b   : > { %s724_s23 = scalar_lea.sflag [#allocation3], %s723_s20 }
 0x25c   : > { %p859_p2 = pnand %p862_p1, %p1047_p6 }
 0x25e   : > { %958 = dma.done.wait (!%p859_p2), %s724_s23, 1024  }
 0x25f   : > { %960 = vsyncadd (!%p859_p2), %s724_s23, 4294966272  ;;  %p14_p3 = scmp.ge.s32.totalorder %s1030_s21, 4   ;;  %s1336_s15 = smov %s967_s16 }
 0x260   : > { %s1337_s16 = smov %s971_s17  ;;  %s1338_s17 = smov %s1041_s24 }
 0x261   : > { %s1339_s18 = smov %s1030_s21  ;;  %16 = sbr.rel (!%p14_p3) target bundleno = 3 (0x3), region = 71 }
 0x268   :  { %729 = vsyncpa [#allocation3], 1 }
 0x269   :  { %731 = vsyncpa [#allocation3 + $0x1], 1 }

</bundles_post_ra>
